<compile_context>
chip_gen: v7x
topology: tpu7x:2x2x1
jax: 0.10.0
libtpu: 0.0.40
codegen_flags: <defaults>
</compile_context>

<pallas_src>
import jax
import jax.numpy as jnp
from jax.experimental import pallas as pl
from jax.experimental.pallas import tpu as pltpu


def _split_every_nth_kernel(x_ref, *out_refs):
    # x_ref block:     (1, C_TILE, n_parts * HW)   lane-dense
    # out_refs[p]:     (1, C_TILE, HW)
    # Channel c == j*n_parts + p maps to lane range [p*HW, (p+1)*HW) of row j
    # after the wrapper reshape, so each part is a static, 128-aligned lane
    # slice of the input ref — written straight to its output (identity copy).
    hw = out_refs[0].shape[-1]
    for p, o_ref in enumerate(out_refs):
        o_ref[...] = x_ref[:, :, p * hw:(p + 1) * hw]


def split_every_nth(x: jax.Array, n_parts: int):
    """Pallas equivalent of SplitEveryNth(n_parts).forward(x) for NCHW input."""
    N, C, H, W = x.shape
    assert C % n_parts == 0, "channel count must be divisible by n_parts"
    Cp = C // n_parts
    HW = H * W
    itemsize = jnp.dtype(x.dtype).itemsize

    # Free (contiguity-preserving) reshape: c = j*n_parts + p  ->  row j,
    # lane offset p*HW.  Minor dim is n_parts*HW (lane-dense).
    xr = x.reshape(N, Cp, n_parts * HW)

    # ---- choose channel-group tile so double-buffered blocks fit VMEM -----
    # per-step bytes ~ 2 * (c_tile * n_parts * HW * itemsize)  (input + outputs),
    # double buffered.  Target <= ~2 MiB for the input block -> well under the
    # 16/32 MiB scoped defaults and v7x's 64 MiB physical VMEM.
    bytes_per_channel_row = n_parts * HW * itemsize
    target_block_bytes = 2 * 1024 * 1024
    c_tile = max(1, min(Cp, target_block_bytes // max(1, bytes_per_channel_row)))
    if c_tile < Cp and c_tile >= 8:
        c_tile -= c_tile % 8          # prefer sublane-aligned tiles
    while Cp % c_tile != 0:           # exact tiling (largest divisor <= candidate)
        c_tile -= 1
    num_c_tiles = Cp // c_tile

    out_shape = tuple(
        jax.ShapeDtypeStruct((N, Cp, HW), x.dtype) for _ in range(n_parts)
    )

    outs = pl.pallas_call(
        _split_every_nth_kernel,
        out_shape=out_shape,
        grid=(N, num_c_tiles),
        in_specs=[
            # Last block dim equals the full array dim (n_parts*HW) -> always
            # legal; second-to-last is c_tile (== Cp or multiple of 8 when big).
            pl.BlockSpec((1, c_tile, n_parts * HW), lambda n, c: (n, c, 0)),
        ],
        out_specs=tuple(
            pl.BlockSpec((1, c_tile, HW), lambda n, c: (n, c, 0))
            for _ in range(n_parts)
        ),
        compiler_params=pltpu.CompilerParams(
            dimension_semantics=("parallel", "parallel"),
            vmem_limit_bytes=32 * 1024 * 1024,
        ),
        cost_estimate=pl.CostEstimate(
            flops=0,
            transcendentals=0,
            bytes_accessed=2 * N * C * H * W * itemsize,
        ),
    )(xr)

    # Free reshape of lane-dense outputs back to (N, C//P, H, W).
    return tuple(o.reshape(N, Cp, H, W) for o in outs)


if __name__ == "__main__":
    key = jax.random.PRNGKey(0)
    N, C, H, W = 2, 4, 16, 16
    n_parts = 2
    x = jax.random.normal(key, (N, C, H, W), dtype=jnp.float32)

    ys = split_every_nth(x, n_parts)
    jax.block_until_ready(ys)

    # Verify against the trivial JAX reference x[:, i::n_parts].
    assert len(ys) == n_parts
    for i, y in enumerate(ys):
        ref = x[:, i::n_parts]
        assert y.shape == ref.shape, (i, y.shape, ref.shape)
        assert jnp.array_equal(y, ref), f"mismatch vs reference for part {i}"

    print("KERNEL_OK")
</pallas_src>

<mosaic_0001>
module attributes {stable_mosaic.version = 11 : i64} {
  func.func @_split_every_nth_kernel(%arg0: i32, %arg1: i32, %arg2: memref<1x2x512xf32, #tpu.memory_space<vmem>>, %arg3: memref<1x2x256xf32, #tpu.memory_space<vmem>>, %arg4: memref<1x2x256xf32, #tpu.memory_space<vmem>>) attributes {dimension_semantics = [#tpu.dimension_semantics<parallel>, #tpu.dimension_semantics<parallel>], iteration_bounds = array<i64: 2, 1>, scalar_prefetch = 0 : i64, scratch_operands = 0 : i64, tpu.core_type = #tpu.core_type<tc>, window_params = [{transform_indices = @transform_0, window_bounds = array<i64: 1, 2, 512>}, {transform_indices = @transform_1, window_bounds = array<i64: 1, 2, 256>}, {transform_indices = @transform_2, window_bounds = array<i64: 1, 2, 256>}]} {
    %c0 = arith.constant 0 : index
    %c0_0 = arith.constant 0 : index
    %c0_1 = arith.constant 0 : index
    %0 = vector.load %arg2[%c0, %c0_0, %c0_1] : memref<1x2x512xf32, #tpu.memory_space<vmem>>, vector<1x2x256xf32>
    %c0_2 = arith.constant 0 : index
    %c0_3 = arith.constant 0 : index
    %c0_4 = arith.constant 0 : index
    %1 = vector.load %arg3[%c0_2, %c0_3, %c0_4] : memref<1x2x256xf32, #tpu.memory_space<vmem>>, vector<1x2x256xf32>
    tpu.vector_store %arg3[%c0_2, %c0_3, %c0_4], %0 {strides = array<i32>} : memref<1x2x256xf32, #tpu.memory_space<vmem>>, vector<1x2x256xf32>,
    %c0_5 = arith.constant 0 : index
    %c0_6 = arith.constant 0 : index
    %c256 = arith.constant 256 : index
    %2 = vector.load %arg2[%c0_5, %c0_6, %c256] : memref<1x2x512xf32, #tpu.memory_space<vmem>>, vector<1x2x256xf32>
    %c0_7 = arith.constant 0 : index
    %c0_8 = arith.constant 0 : index
    %c0_9 = arith.constant 0 : index
    %3 = vector.load %arg4[%c0_7, %c0_8, %c0_9] : memref<1x2x256xf32, #tpu.memory_space<vmem>>, vector<1x2x256xf32>
    tpu.vector_store %arg4[%c0_7, %c0_8, %c0_9], %2 {strides = array<i32>} : memref<1x2x256xf32, #tpu.memory_space<vmem>>, vector<1x2x256xf32>,
    return
  }
  func.func @transform_0(%arg0: i32, %arg1: i32) -> (i32, i32, i32) {
    %c0_i32 = arith.constant 0 : i32
    %c0_i32_0 = arith.constant 0 : i32
    return %arg0, %arg1, %c0_i32 : i32, i32, i32
  }
  func.func @transform_1(%arg0: i32, %arg1: i32) -> (i32, i32, i32) {
    %c0_i32 = arith.constant 0 : i32
    %c0_i32_0 = arith.constant 0 : i32
    return %arg0, %arg1, %c0_i32 : i32, i32, i32
  }
  func.func @transform_2(%arg0: i32, %arg1: i32) -> (i32, i32, i32) {
    %c0_i32 = arith.constant 0 : i32
    %c0_i32_0 = arith.constant 0 : i32
    return %arg0, %arg1, %c0_i32 : i32, i32, i32
  }
}

</mosaic_0001>

<bundles_post_ra>
// kernel: tpu_custom_call.1
= control target key start
LH: loop header
LB: loop body
LE: loop exit
PB: predicated region body
PF: predicated region fallthrough
CT: control target
= control target key end

     0   :  { %8 = vsyncpa [#allocation3], 0  ;;  %s807_s0 = inlined_call_operand.hbm [shape: f32[2,2,512], index: 0, kind: input, shape index: {}]   ;;  %s808_s1 = inlined_call_operand.hbm [shape: f32[2,2,256], index: 1, kind: output, shape index: {0}]   ;;  %s809_s2 = inlined_call_operand.hbm [shape: f32[2,2,256], index: 2, kind: output, shape index: {1}]  }
   0x1   :  { %10 = vsyncpa [#allocation3 + $0x1], 0 }
   0x2   :  { %11 = vsyncpa [#allocation4], 0 }
   0x3   :  { %13 = vsyncpa [#allocation4 + $0x1], 0 }
   0x4   :  { %14 = vsyncpa [#allocation7], 0 }
   0x5   :  { %16 = vsyncpa [#allocation7 + $0x1], 0  ;;  %s605_s9 = smov 0   ;;  %s607_s10 = smov 0  }
   0x6   :  { %s609_s11 = smov 0   ;;  %s611_s12 = smov 0  }
   0x7   :  { %s613_s13 = smov 0   ;;  %s615_s14 = smov 0  }
   0x8 LB: > { %s352_s15 = sadd.s32 4294967295, %s585_s14   ;;  %s353_s16 = sadd.s32 4294967294, %s585_s14   ;;  %s585_s14 = sphi %s615_s14, %s22_s14   ;;  %s581_s13 = sphi %s613_s13, %s825_s13   ;;  %s577_s12 = sphi %s611_s12, %s824_s12   ;;  %s573_s11 = sphi %s609_s11, %s823_s11   ;;  %s569_s10 = sphi %s607_s10, %s822_s10   ;;  %s565_s9 = sphi %s605_s9, %s821_s9  }
   0x9   : > { %s34_s17 = sadd.s32 1, %s581_s13  ;;  %s43_s18 = sadd.s32 1, %s573_s11 }
   0xa   : > { %p36_p0 = scmp.ge.s32.totalorder %s34_s17, 2  ;;  %p50_p1 = scmp.ne.s32.totalorder %s573_s11, %s569_s10 }
   0xb   : > { %p51_p2 = scmp.eq.s32.totalorder %s585_s14, 0  ;;  %p56_p3 = scmp.ne.s32.totalorder %s569_s10, %s565_s9 }
   0xc   : > { %s827_s17 = smov (%p36_p0, %s34_s17), 0  ;;  %p57_p5 = scmp.eq.s32.totalorder %s352_s15, 0 }
   0xd   : > { %p646_p4 = por %p51_p2, %p50_p1  ;;  %s38_s20 = ssub.s32 %s581_s13, %s827_s17 }
   0xe   : > { %p82_p6 = scmp.eq.s32.totalorder %s352_s15, 1  ;;  %p41_p7 = scmp.eq.s32.totalorder %s38_s20, 0 }
   0xf   : > { %p652_p8 = por %p57_p5, %p56_p3  ;;  %p88_p10 = scmp.eq.s32.totalorder %s353_s16, 1 }
  0x10   : > { %p656_p9 = por %p82_p6, %p50_p1  ;;  %p391_p13 = scmp.lt.s32.totalorder %s585_s14, 2 }
  0x11   : > { %s661_s23 = scalar_select %p41_p7, %s573_s11, %s43_s18  }
  0x12   : > { %s813_s22 = scalar_select %p656_p9, 1, 0 }
  0x13   : > { %p663_p11 = por %p88_p10, %p56_p3  ;;  %s136_s25 = sand.u32 1, %s573_s11  }
  0x14   : > { %s356_s26 = sshll.u32 %s136_s25, 3  ;;  %s371_s27 = sshll.u32 %s581_s13, 7 }
  0x15   : > { %s814_s24 = scalar_select %p663_p11, 1, 0 }
  0x16   : > { %s674_s30 = scalar_lea.hbm %s807_s0, %s371_s27  ;;  %s140_s3 = scalar_lea.vmem [#allocation2], %s356_s26 }
  0x17   : > { %s150_s4 = sshll.u32 %s140_s3, 4  ;;  %p680_p0 = pnand %p391_p13, %p646_p4  ;;  %s676_s4 = int_to_ptr.vmem [resolvable:$true] %s150_s4 }
  0x18   : > { %s137_s6 = scalar_lea.sflag [#allocation3], %s136_s25  ;;  %s441_s7 = scalar_lea.hbm %s674_s30, 128 }
  0x19   : > { %p442_p3 = scmp.ne.s32.totalorder %s674_s30, %s441_s7  ;;  %p443_p5 = pneg %p680_p0 }
  0x1a   : > { %s446_s16 = scalar_lea.hbm %s807_s0, 256  ;;  %p447_p4 = scmp.lt.u32.totalorder %s674_s30, %s807_s0 }
  0x1b   : > { %p444_p6 = pnand %p443_p5, %p442_p3  ;;  %p448_p10 = scmp.lt.u32.totalorder %s446_s16, %s441_s7 }
  0x1c   : > { %p450_p12 = scmp.lt.u32.totalorder %s441_s7, %s674_s30 }
  0x1d   : > { %p445_p7 = pneg %p444_p6  ;;  %p449_p13 = por %p448_p10, %p447_p4 }
  0x1f   : > { %p451_p1 = por %p450_p12, %p449_p13 }
  0x21   : > { %p452_p2 = pnand %p451_p1, %p445_p7 }
  0x23   : > { %455 = shalt.err (!%p452_p2)
}
  0x24   : > { %s456_s20 = scalar_lea.vmem %s676_s4, 128  ;;  %s587_s25 = smov [#allocation2]  }
  0x25   : > { %p457_p3 = scmp.ne.s32.totalorder %s676_s4, %s456_s20  ;;  %s461_s26 = sshll.u32 %s587_s25, 4  ;;  %s462_s26 = int_to_ptr.vmem [resolvable:$false] %s461_s26 }
  0x26   : > { %s463_s27 = scalar_lea.vmem %s462_s26, 256  ;;  %p464_p9 = scmp.lt.s32.totalorder %s676_s4, %s462_s26 }
  0x27   : > { %p459_p6 = pnand %p457_p3, %p443_p5  ;;  %p465_p4 = scmp.lt.s32.totalorder %s463_s27, %s456_s20 }
  0x29   : > { %p460_p11 = pneg %p459_p6  ;;  %p466_p10 = por %p465_p4, %p464_p9 }
  0x2b   : > { %p467_p12 = pnand %p466_p10, %p460_p11 }
  0x2d   : > { %470 = shalt.err (!%p467_p12)
}
  0x2e   : > { %383 = dma.hbm_to_vmem [thread:$0]  (!%p680_p0), %s674_s30, 128, %s676_s4, %s137_s6  }
  0x2f   : > { %p816_p1 = scmp.lt.s32.totalorder %s585_s14, 3  ;;  %p817_p2 = scmp.ge.s32.totalorder %s585_s14, 1 }
  0x31   : > { %p156_p5 = pnand %p817_p2, %p816_p1 }
  0x32   : > { %s716_s28 = sand.u32 (!%p156_p5), 1, %s569_s10  }
  0x33   : > { %159 = sbr.rel (%p156_p5) target bundleno = 110 (0x6e), region = 24  ;;  %s360_s29 = sshll.u32 (!%p156_p5), %s716_s28, 3 }
  0x34   : > { %s162_s3 = scalar_lea.sflag (!%p156_p5), [#allocation3], %s716_s28  ;;  %s165_s7 = scalar_lea.vmem (!%p156_p5), [#allocation2], %s360_s29 }
  0x3a   : > { %552 = dma.done.wait (%p652_p8), %s162_s3, 128  }
  0x3b   : > { %554 = vsyncadd (%p652_p8), %s162_s3, 4294967168  ;;  %s361_s30 = sshll.u32 %s716_s28, 2  ;;  %s372_s15 = sshll.u32 %s577_s12, 6  ;;  %v191_v0 = vld [vmem:[%s165_s7] sm:$0xf] }
  0x3c   : > { %s183_s4 = scalar_lea.vmem [#allocation5], %s361_s30  ;;  %s190_s6 = scalar_lea.vmem [#allocation6], %s361_s30  ;;  %v193_v1 = vld [vmem:[%s165_s7 + $0x4] sm:$0xf] }
  0x3d   : > { %s217_s5 = sshll.u32 %s183_s4, 4  ;;  %s233_s8 = sshll.u32 %s190_s6, 4  ;;  %192 = vst [vmem:[%s183_s4] sm:$0xf] %v191_v0  ;;  %194 = vst [vmem:[%s190_s6] sm:$0xf] %v193_v1  ;;  %s726_s5 = int_to_ptr.vmem [resolvable:$true] %s217_s5  ;;  %s728_s8 = int_to_ptr.vmem [resolvable:$true] %s233_s8 }
  0x3e   : > { %s733_s21 = scalar_lea.hbm %s808_s1, %s372_s15  ;;  %s738_s25 = scalar_lea.hbm %s809_s2, %s372_s15 }
  0x3f   : > { %s196_s12 = scalar_lea.sflag [#allocation4], %s716_s28  ;;  %s471_s26 = scalar_lea.vmem %s726_s5, 64 }
  0x40   : > { %p472_p8 = scmp.ne.s32.totalorder %s726_s5, %s471_s26  ;;  %p818_p9 = scmp.ne.s32.totalorder %s813_s22, 0 }
  0x41   : > { %s588_s27 = smov [#allocation5]  }
  0x42   : > { %p473_p11 = pnand %p472_p8, %p818_p9  ;;  %s475_s29 = sshll.u32 %s588_s27, 4  ;;  %s476_s29 = int_to_ptr.vmem [resolvable:$false] %s475_s29 }
  0x43   : > { %s477_s3 = scalar_lea.vmem %s476_s29, 128  ;;  %p478_p7 = scmp.lt.s32.totalorder %s726_s5, %s476_s29 }
  0x44   : > { %p474_p0 = pneg %p473_p11  ;;  %p479_p13 = scmp.lt.s32.totalorder %s477_s3, %s471_s26 }
  0x46   : > { %p480_p3 = por %p479_p13, %p478_p7 }
  0x48   : > { %p481_p6 = pnand %p480_p3, %p474_p0 }
  0x4a   : > { %484 = shalt.err (!%p481_p6)
}
  0x4b   : > { %s485_s7 = scalar_lea.hbm %s733_s21, 64  ;;  %s489_s6 = scalar_lea.hbm %s808_s1, 128 }
  0x4c   : > { %p486_p4 = scmp.ne.s32.totalorder %s733_s21, %s485_s7  ;;  %p490_p1 = scmp.lt.u32.totalorder %s733_s21, %s808_s1 }
  0x4d   : > { %p491_p2 = scmp.lt.u32.totalorder %s489_s6, %s485_s7  ;;  %p493_p8 = scmp.lt.u32.totalorder %s485_s7, %s733_s21 }
  0x4e   : > { %p487_p10 = pnand %p486_p4, %p818_p9 }
  0x4f   : > { %p492_p5 = por %p491_p2, %p490_p1 }
  0x50   : > { %p488_p12 = pneg %p487_p10 }
  0x51   : > { %p494_p11 = por %p493_p8, %p492_p5 }
  0x53   : > { %p495_p0 = pnand %p494_p11, %p488_p12 }
  0x55   : > { %498 = shalt.err (!%p495_p0)
}
  0x56   : > { %376 = dma.vmem_to_hbm [thread:$0]  (%p818_p9), %s726_s5, 64, %s733_s21, %s196_s12  }
  0x57   : > { %s201_s18 = scalar_lea.sflag [#allocation7], %s716_s28  ;;  %s499_s19 = scalar_lea.vmem %s728_s8, 64 }
  0x58   : > { %p500_p7 = scmp.ne.s32.totalorder %s728_s8, %s499_s19  ;;  %s589_s20 = smov [#allocation6]  }
  0x59   : > { %s503_s26 = sshll.u32 %s589_s20, 4  ;;  %s504_s26 = int_to_ptr.vmem [resolvable:$false] %s503_s26 }
  0x5a   : > { %p501_p13 = pnand %p500_p7, %p818_p9  ;;  %s505_s27 = scalar_lea.vmem %s504_s26, 128 }
  0x5b   : > { %p506_p6 = scmp.lt.s32.totalorder %s728_s8, %s504_s26  ;;  %p507_p4 = scmp.lt.s32.totalorder %s505_s27, %s499_s19 }
  0x5c   : > { %p502_p3 = pneg %p501_p13 }
  0x5d   : > { %p508_p10 = por %p507_p4, %p506_p6 }
  0x5f   : > { %p509_p12 = pnand %p508_p10, %p502_p3 }
  0x61   : > { %512 = shalt.err (!%p509_p12)
}
  0x62   : > { %s513_s28 = scalar_lea.hbm %s738_s25, 64  ;;  %s517_s12 = scalar_lea.hbm %s809_s2, 128 }
  0x63   : > { %p514_p1 = scmp.ne.s32.totalorder %s738_s25, %s513_s28  ;;  %p518_p8 = scmp.lt.u32.totalorder %s738_s25, %s809_s2 }
  0x64   : > { %p519_p11 = scmp.lt.u32.totalorder %s517_s12, %s513_s28  ;;  %p521_p7 = scmp.lt.u32.totalorder %s513_s28, %s738_s25 }
  0x65   : > { %p515_p2 = pnand %p514_p1, %p818_p9 }
  0x66   : > { %p520_p0 = por %p519_p11, %p518_p8 }
  0x67   : > { %p516_p5 = pneg %p515_p2 }
  0x68   : > { %p522_p13 = por %p521_p7, %p520_p0 }
  0x6a   : > { %p523_p3 = pnand %p522_p13, %p516_p5 }
  0x6c   : > { %526 = shalt.err (!%p523_p3)
}
  0x6d   : > { %377 = dma.vmem_to_hbm [thread:$0]  (%p818_p9), %s728_s8, 64, %s738_s25, %s201_s18  }
  0x6e PF: > { %s245_s7 = sand.u32 1, %s565_s9   ;;  %p819_p6 = scmp.ne.s32.totalorder %s814_s24, 0 }
  0x6f   : > { %p820_p4 = scmp.ge.s32.totalorder %s585_s14, 2  ;;  %s246_s30 = scalar_lea.sflag [#allocation4], %s245_s7 }
  0x71   : > { %p385_p10 = pnand %p820_p4, %p819_p6 }
  0x73   : > { %556 = dma.done.wait (!%p385_p10), %s246_s30, 64  }
  0x74   : > { %558 = vsyncadd (!%p385_p10), %s246_s30, 4294967232  ;;  %s255_s4 = scalar_lea.sflag [#allocation7], %s245_s7 }
  0x75   : > { %560 = dma.done.wait (!%p385_p10), %s255_s4, 64  }
  0x76   : > { %562 = vsyncadd (!%p385_p10), %s255_s4, 4294967232  ;;  %s22_s14 = sadd.s32 1, %s585_s14   ;;  %s821_s9 = smov %s569_s10 }
  0x77   : > { %p19_p12 = scmp.ge.s32.totalorder %s22_s14, 4   ;;  %s822_s10 = smov %s573_s11 }
  0x78   : > { %s823_s11 = smov %s661_s23  ;;  %s824_s12 = smov %s581_s13 }
  0x79   : > { %s825_s13 = smov %s827_s17  ;;  %21 = sbr.rel (!%p19_p12) target bundleno = 8 (0x8), region = 86 }
  0x80   :  { %260 = vsyncpa [#allocation3], 1 }
  0x81   :  { %262 = vsyncpa [#allocation3 + $0x1], 1 }
  0x82   :  { %263 = vsyncpa [#allocation4], 1 }
  0x83   :  { %265 = vsyncpa [#allocation4 + $0x1], 1 }
  0x84   :  { %266 = vsyncpa [#allocation7], 1 }
  0x85   :  { %268 = vsyncpa [#allocation7 + $0x1], 1 }

</bundles_post_ra>
